<compile_context>
chip_gen: v5e
topology: v5e:2x2
jax: 0.10.0
libtpu: 0.0.40
codegen_flags: <defaults>
</compile_context>

<pallas_src>
import functools

import jax
import jax.numpy as jnp
from jax.experimental import pallas as pl
from jax.experimental.pallas import tpu as pltpu

TILE_DST = 128            # destination-node tile (grid axis 0, "parallel")
TILE_SRC = 128            # source-node tile   (grid axis 1, "arbitrary" reduction)
LANE = 128                # feature dims padded to this for lane-dense vld/vst
VMEM_LIMIT = 32 * 1024 * 1024   # explicit scoped-VMEM limit (fits v5e/v6e/v7x)
_BIG = 1.0e30
_MASK_NEG = -_BIG         # finite sentinel (avoids -inf NaNs in online softmax)
# NOTE: for large graphs raise TILE_* to 256-512 on v5e/v6e; keep tiles smaller
# (and consider pl.Buffered(3)) on v7x (64 MiB VMEM, 3.2 TB/s HBM).


def _round_up(v, m):
    return (v + m - 1) // m * m


def _block_diag(a):
    """[heads, C] attention vector -> block-diagonal [heads*C, heads] matmul RHS."""
    h, c = a.shape
    eye = jnp.eye(h, dtype=a.dtype)
    return (a[:, :, None] * eye[:, None, :]).reshape(h * c, h)


# --------------------------- kernel 1: projection -----------------------------

def _gat_project_kernel(x_ref, w_ref, acat_ref, h_ref, alpha_ref):
    """h = x @ W (bf16 MXU, f32 acc); alpha = h @ [A_dst_blk | A_src_blk] fused."""
    x = x_ref[...].astype(jnp.bfloat16)
    h = jnp.dot(x, w_ref[...], preferred_element_type=jnp.float32)      # [TM, P]
    h_bf = h.astype(jnp.bfloat16)
    # single fused MXU call for ALL per-head dst/src logits ([TM, 2*heads]).
    alpha_ref[...] = jnp.dot(h_bf, acat_ref[...],
                             preferred_element_type=jnp.float32)
    h_ref[...] = h_bf


# ---------------- kernel 2: masked edge-softmax + aggregation -----------------

def _gat_attn_kernel(ad_ref, asT_ref, h_ref, adj_ref, bias_ref, out_ref,
                     m_sc, l_sc, acc_sc, *, heads, out_ch, apply_elu):
    """Online-softmax attention over src tiles; finalize writes one dense tile.

    ad_ref  : [TILE_DST, heads]      per-head dst logits (f32)
    asT_ref : [heads, TILE_SRC]      per-head src logits, pre-transposed (f32)
    h_ref   : [TILE_SRC, P]          projected src features (bf16, P=128-padded)
    adj_ref : [TILE_DST, TILE_SRC]   adjacency mask (bf16 0/1), adj[dst, src]
    bias_ref: [1, P]                 bias (f32, zero-padded)
    out_ref : [TILE_DST, P]          layer output (f32)
    """
    k = pl.program_id(1)

    @pl.when(k == 0)
    def _init():
        m_sc[...] = jnp.full_like(m_sc, _MASK_NEG)
        l_sc[...] = jnp.zeros_like(l_sc)
        acc_sc[...] = jnp.zeros_like(acc_sc)

    # additive mask: 0 on edges, -1e30 off-edge; computed once per (dst,src)
    # tile and shared by every head (no per-head cmp/select).
    neg_bias = (adj_ref[...].astype(jnp.float32) - 1.0) * jnp.float32(_BIG)

    a_dst = ad_ref[...]            # [TM, H]
    a_srcT = asT_ref[...]          # [H, TS]
    h_src = h_ref[...]             # [TS, P] bf16

    for hd in range(heads):        # heads is small & static -> unrolled
        lo, hi = hd * out_ch, (hd + 1) * out_ch
        # e[i, j] = <h_i, a_dst> + <h_j, a_src>; no [TS, C] transpose needed.
        raw = a_dst[:, hd:hd + 1] + a_srcT[hd:hd + 1, :]           # [TM, TS]
        # LeakyReLU(0.2) as one maximum(); applied pre-mask (matches PyG).
        e = jnp.maximum(raw, 0.2 * raw) + neg_bias
        # ---- online softmax update (flash-attention style) ----
        m_prev = m_sc[:, hd:hd + 1]                                # [TM, 1]
        m_new = jnp.maximum(m_prev, jnp.max(e, axis=1, keepdims=True))
        scale = jnp.exp(m_prev - m_new)
        p = jnp.exp(e - m_new)                                     # [TM, TS]
        l_sc[:, hd:hd + 1] = (scale * l_sc[:, hd:hd + 1]
                              + jnp.sum(p, axis=1, keepdims=True))
        m_sc[:, hd:hd + 1] = m_new
        acc_sc[:, lo:hi] = scale * acc_sc[:, lo:hi] + jnp.dot(
            p.astype(jnp.bfloat16), h_src[:, lo:hi],
            preferred_element_type=jnp.float32)

    @pl.when(k == pl.num_programs(1) - 1)
    def _finalize():
        # normalization folded into finalize; approx reciprocal -> EUP slot.
        inv_l = pl.reciprocal(l_sc[...], approx=True)              # [TM, H]
        for hd in range(heads):
            lo, hi = hd * out_ch, (hd + 1) * out_ch
            acc_sc[:, lo:hi] = acc_sc[:, lo:hi] * inv_l[:, hd:hd + 1]
        out = acc_sc[...] + bias_ref[...]
        if apply_elu:
            out = jnp.where(out > 0, out, jnp.expm1(jnp.minimum(out, 0.0)))
        out_ref[...] = out.astype(out_ref.dtype)   # single lane-dense store


# ------------------------------ layer wrapper ---------------------------------

def gat_layer(x, w, a_src, a_dst, bias, adj_bf16, *, heads, out_ch, apply_elu):
    """One GATConv layer. x:[N,F] (N multiple of tile), returns [N, pad128(H*C)]."""
    n, f_in = x.shape
    assert n % TILE_DST == 0 and n % TILE_SRC == 0
    hc = heads * out_ch
    p = _round_up(hc, LANE)

    # pad feature dims to 128 lanes (stripped by the caller at the very end)
    w_pad = jnp.zeros((f_in, p), jnp.float32).at[:, :hc].set(w)
    w_pad = w_pad.astype(jnp.bfloat16)
    bias_pad = jnp.zeros((1, p), jnp.float32).at[0, :hc].set(bias)
    # fused attention-logit RHS: [:, :heads] -> alpha_dst, [:, heads:] -> alpha_src
    a_cat = jnp.zeros((p, 2 * heads), jnp.float32)
    a_cat = a_cat.at[:hc, :heads].set(_block_diag(a_dst))
    a_cat = a_cat.at[:hc, heads:].set(_block_diag(a_src))
    a_cat = a_cat.astype(jnp.bfloat16)

    n_i = n // TILE_DST
    n_k = n // TILE_SRC

    # ---- kernel 1: projection + fused logits (tiled over rows) ----
    h_bf16, alpha = pl.pallas_call(
        _gat_project_kernel,
        out_shape=(jax.ShapeDtypeStruct((n, p), jnp.bfloat16),
                   jax.ShapeDtypeStruct((n, 2 * heads), jnp.float32)),
        grid=(n_i,),
        in_specs=[pl.BlockSpec((TILE_DST, f_in), lambda i: (i, 0)),
                  pl.BlockSpec((f_in, p), lambda i: (0, 0)),
                  pl.BlockSpec((p, 2 * heads), lambda i: (0, 0))],
        out_specs=(pl.BlockSpec((TILE_DST, p), lambda i: (i, 0)),
                   pl.BlockSpec((TILE_DST, 2 * heads), lambda i: (i, 0))),
        compiler_params=pltpu.CompilerParams(
            dimension_semantics=("parallel",),
            vmem_limit_bytes=VMEM_LIMIT),
    )(x, w_pad, a_cat)

    alpha_dst = alpha[:, :heads]            # [N, H]
    alpha_src_t = alpha[:, heads:].T        # [H, N] tiny transpose done by XLA

    # ---- kernel 2: edge softmax + aggregation (online softmax over src tiles)
    kernel = functools.partial(_gat_attn_kernel, heads=heads, out_ch=out_ch,
                               apply_elu=apply_elu)
    out = pl.pallas_call(
        kernel,
        out_shape=jax.ShapeDtypeStruct((n, p), jnp.float32),
        grid=(n_i, n_k),
        in_specs=[pl.BlockSpec((TILE_DST, heads), lambda i, k: (i, 0)),
                  pl.BlockSpec((heads, TILE_SRC), lambda i, k: (0, k)),
                  pl.BlockSpec((TILE_SRC, p), lambda i, k: (k, 0)),
                  pl.BlockSpec((TILE_DST, TILE_SRC), lambda i, k: (i, k)),
                  pl.BlockSpec((1, p), lambda i, k: (0, 0))],
        out_specs=pl.BlockSpec((TILE_DST, p), lambda i, k: (i, 0)),
        scratch_shapes=[pltpu.VMEM((TILE_DST, heads), jnp.float32),   # running max
                        pltpu.VMEM((TILE_DST, heads), jnp.float32),   # running sum
                        pltpu.VMEM((TILE_DST, p), jnp.float32)],      # accumulator
        compiler_params=pltpu.CompilerParams(
            dimension_semantics=("parallel", "arbitrary"),   # dst tiles across TCs on v7x
            vmem_limit_bytes=VMEM_LIMIT),
    )(alpha_dst, alpha_src_t, h_bf16, adj_bf16, bias_pad)
    return out


# --------------------------- GATBase forward ---------------------------------

def gat_base_forward(x, edge_index, params, *, heads, hidden, num_classes):
    n = x.shape[0]
    n_pad = _round_up(n, max(TILE_DST, TILE_SRC))
    src, dst = edge_index[0], edge_index[1]
    # dense mask adj[dst, src]; self-loops for real nodes (PyG add_self_loops=True)
    adj = jnp.zeros((n_pad, n_pad), jnp.float32).at[dst, src].set(1.0)
    adj = adj.at[jnp.arange(n), jnp.arange(n)].set(1.0)
    adj = adj.astype(jnp.bfloat16)                      # halves adj DMA traffic
    x_pad = jnp.zeros((n_pad, x.shape[1]), jnp.float32).at[:n, :].set(x)

    # F.dropout(p=0.6) -> identity in eval mode
    h1 = gat_layer(x_pad, params["w1"], params["a_src1"], params["a_dst1"],
                   params["b1"], adj, heads=heads, out_ch=hidden, apply_elu=True)
    # h1 is [n_pad, 128] with zero padding beyond heads*hidden; keep it
    # lane-dense and zero-pad w2's input rows instead of slicing h1.
    w2 = params["w2"]
    w2_pad = jnp.zeros((h1.shape[1], w2.shape[1]), jnp.float32)
    w2_pad = w2_pad.at[:w2.shape[0], :].set(w2)
    # second F.dropout -> identity in eval mode
    out = gat_layer(h1, w2_pad, params["a_src2"], params["a_dst2"],
                    params["b2"], adj, heads=1, out_ch=num_classes,
                    apply_elu=False)
    return out[:n, :num_classes]


# ---------------------------- pure-JAX reference -----------------------------
# Mirrors the kernel's bf16-at-the-MXU casts (f32 accumulation, f32 elementwise)
# so the comparison is tight; the math is the standard dense-masked GATConv.

def _gat_layer_ref(x, w, a_src, a_dst, bias, adj, heads, out_ch, apply_elu):
    n = x.shape[0]
    h = jnp.dot(x.astype(jnp.bfloat16), w.astype(jnp.bfloat16),
                preferred_element_type=jnp.float32)
    h3 = h.astype(jnp.bfloat16).reshape(n, heads, out_ch)
    a_d = jnp.einsum("nhc,hc->nh", h3, a_dst.astype(jnp.bfloat16),
                     preferred_element_type=jnp.float32)
    a_s = jnp.einsum("nhc,hc->nh", h3, a_src.astype(jnp.bfloat16),
                     preferred_element_type=jnp.float32)
    e = a_d[:, None, :] + a_s[None, :, :]                # [dst, src, H]
    e = jnp.maximum(e, 0.2 * e)                          # LeakyReLU pre-mask (as in PyG)
    mask = (adj > 0)[:, :, None]
    e = jnp.where(mask, e, _MASK_NEG)
    p = jnp.exp(e - jnp.max(e, axis=1, keepdims=True))   # masked -> exact 0
    num = jnp.einsum("dsh,shc->dhc", p.astype(jnp.bfloat16), h3,
                     preferred_element_type=jnp.float32)
    den = jnp.sum(p, axis=1)                             # [dst, H]
    out = (num / den[:, :, None]).reshape(n, heads * out_ch) + bias
    return jax.nn.elu(out) if apply_elu else out


def gat_base_ref(x, edge_index, params, *, heads, hidden, num_classes):
    n = x.shape[0]
    src, dst = edge_index[0], edge_index[1]
    adj = jnp.zeros((n, n), jnp.float32).at[dst, src].set(1.0)
    adj = adj.at[jnp.arange(n), jnp.arange(n)].set(1.0)
    h = _gat_layer_ref(x, params["w1"], params["a_src1"], params["a_dst1"],
                       params["b1"], adj, heads, hidden, True)
    return _gat_layer_ref(h, params["w2"], params["a_src2"], params["a_dst2"],
                          params["b2"], adj, 1, num_classes, False)


# ----------------------------------- main ------------------------------------

if __name__ == "__main__":
    # small synthetic graph consistent with GATBase(data, hidden_channels, heads);
    # N=256 gives a 2x2 (dst, src) grid so the online softmax + pipelining is
    # actually exercised.
    N, F_IN, HIDDEN, HEADS, NUM_CLASSES, E = 256, 64, 8, 4, 4, 1024

    key = jax.random.PRNGKey(0)
    ks = jax.random.split(key, 8)

    x = jax.random.normal(ks[0], (N, F_IN), jnp.float32)
    edge_index = jax.random.randint(ks[1], (2, E), 0, N, jnp.int32)

    def glorot(k, shape):
        lim = jnp.sqrt(6.0 / sum(shape))
        return jax.random.uniform(k, shape, jnp.float32, -lim, lim)

    params = {
        # conv1: GATConv(F_IN -> HIDDEN, heads=HEADS, concat=True)
        "w1": glorot(ks[2], (F_IN, HEADS * HIDDEN)),
        "a_src1": glorot(ks[3], (HEADS, HIDDEN)),
        "a_dst1": glorot(ks[4], (HEADS, HIDDEN)),
        "b1": jnp.zeros((HEADS * HIDDEN,), jnp.float32),
        # conv2: GATConv(HEADS*HIDDEN -> NUM_CLASSES, heads=1)
        "w2": glorot(ks[5], (HEADS * HIDDEN, NUM_CLASSES)),
        "a_src2": glorot(ks[6], (1, NUM_CLASSES)),
        "a_dst2": glorot(ks[7], (1, NUM_CLASSES)),
        "b2": jnp.zeros((NUM_CLASSES,), jnp.float32),
    }

    out = gat_base_forward(x, edge_index, params, heads=HEADS, hidden=HIDDEN,
                           num_classes=NUM_CLASSES)
    out = jax.block_until_ready(out)

    ref = gat_base_ref(x, edge_index, params, heads=HEADS, hidden=HIDDEN,
                       num_classes=NUM_CLASSES)
    assert out.shape == (N, NUM_CLASSES)
    max_err = float(jnp.max(jnp.abs(out - ref)))
    assert jnp.allclose(out, ref, atol=2e-2, rtol=2e-2), \
        f"mismatch vs JAX ref (max abs err {max_err})"

    print("KERNEL_OK")
</pallas_src>

<mosaic_0001>
module attributes {stable_mosaic.version = 11 : i64} {
  func.func @_gat_project_kernel(%arg0: i32, %arg1: memref<128x64xf32, #tpu.memory_space<vmem>>, %arg2: memref<64x128xbf16, #tpu.memory_space<vmem>>, %arg3: memref<128x8xbf16, #tpu.memory_space<vmem>>, %arg4: memref<128x128xbf16, #tpu.memory_space<vmem>>, %arg5: memref<128x8xf32, #tpu.memory_space<vmem>>) attributes {dimension_semantics = [#tpu.dimension_semantics<parallel>], iteration_bounds = array<i64: 2>, scalar_prefetch = 0 : i64, scratch_operands = 0 : i64, tpu.core_type = #tpu.core_type<tc>, window_params = [{transform_indices = @transform_0, window_bounds = array<i64: 128, 64>}, {pipeline_mode = #tpu.pipeline_mode<synchronous>, transform_indices = @transform_1, window_bounds = array<i64: 64, 128>}, {pipeline_mode = #tpu.pipeline_mode<synchronous>, transform_indices = @transform_2, window_bounds = array<i64: 128, 8>}, {transform_indices = @transform_3, window_bounds = array<i64: 128, 128>}, {transform_indices = @transform_4, window_bounds = array<i64: 128, 8>}]} {
    %c0 = arith.constant 0 : index
    %c0_0 = arith.constant 0 : index
    %0 = vector.load %arg1[%c0, %c0_0] : memref<128x64xf32, #tpu.memory_space<vmem>>, vector<128x64xf32>
    %1 = arith.truncf %0 : vector<128x64xf32> to vector<128x64xbf16>
    %c0_1 = arith.constant 0 : index
    %c0_2 = arith.constant 0 : index
    %2 = vector.load %arg2[%c0_1, %c0_2] : memref<64x128xbf16, #tpu.memory_space<vmem>>, vector<64x128xbf16>
    %cst = arith.constant dense<0.000000e+00> : vector<128x128xf32>
    %3 = tpu.matmul %1, %2, %cst {dimension_numbers = #tpu.dot_dimension_numbers<[1], [0], [0], [1], [0, 0, 1, 1], [], []>} : vector<128x64xbf16>, vector<64x128xbf16>, vector<128x128xf32> -> vector<128x128xf32>
    %4 = arith.truncf %3 : vector<128x128xf32> to vector<128x128xbf16>
    %c0_3 = arith.constant 0 : index
    %c0_4 = arith.constant 0 : index
    %5 = vector.load %arg3[%c0_3, %c0_4] : memref<128x8xbf16, #tpu.memory_space<vmem>>, vector<128x8xbf16>
    %cst_5 = arith.constant dense<0.000000e+00> : vector<128x8xf32>
    %6 = tpu.matmul %4, %5, %cst_5 {dimension_numbers = #tpu.dot_dimension_numbers<[1], [0], [0], [1], [0, 0, 1, 1], [], []>} : vector<128x128xbf16>, vector<128x8xbf16>, vector<128x8xf32> -> vector<128x8xf32>
    %c0_6 = arith.constant 0 : index
    %c0_7 = arith.constant 0 : index
    %7 = vector.load %arg5[%c0_6, %c0_7] : memref<128x8xf32, #tpu.memory_space<vmem>>, vector<128x8xf32>
    tpu.vector_store %arg5[%c0_6, %c0_7], %6 {strides = array<i32>} : memref<128x8xf32, #tpu.memory_space<vmem>>, vector<128x8xf32>,
    %c0_8 = arith.constant 0 : index
    %c0_9 = arith.constant 0 : index
    %8 = vector.load %arg4[%c0_8, %c0_9] : memref<128x128xbf16, #tpu.memory_space<vmem>>, vector<128x128xbf16>
    tpu.vector_store %arg4[%c0_8, %c0_9], %4 {strides = array<i32>} : memref<128x128xbf16, #tpu.memory_space<vmem>>, vector<128x128xbf16>,
    return
  }
  func.func @transform_0(%arg0: i32) -> (i32, i32) {
    %c0_i32 = arith.constant 0 : i32
    %c0_i32_0 = arith.constant 0 : i32
    return %arg0, %c0_i32 : i32, i32
  }
  func.func @transform_1(%arg0: i32) -> (i32, i32) {
    %c0_i32 = arith.constant 0 : i32
    %c0_i32_0 = arith.constant 0 : i32
    %c0_i32_1 = arith.constant 0 : i32
    return %c0_i32, %c0_i32_0 : i32, i32
  }
  func.func @transform_2(%arg0: i32) -> (i32, i32) {
    %c0_i32 = arith.constant 0 : i32
    %c0_i32_0 = arith.constant 0 : i32
    %c0_i32_1 = arith.constant 0 : i32
    return %c0_i32, %c0_i32_0 : i32, i32
  }
  func.func @transform_3(%arg0: i32) -> (i32, i32) {
    %c0_i32 = arith.constant 0 : i32
    %c0_i32_0 = arith.constant 0 : i32
    return %arg0, %c0_i32 : i32, i32
  }
  func.func @transform_4(%arg0: i32) -> (i32, i32) {
    %c0_i32 = arith.constant 0 : i32
    %c0_i32_0 = arith.constant 0 : i32
    return %arg0, %c0_i32 : i32, i32
  }
}

</mosaic_0001>

<bundles_post_ra>
// kernel: tpu_custom_call.1
= control target key start
LH: loop header
LB: loop body
LE: loop exit
PB: predicated region body
PF: predicated region fallthrough
CT: control target
= control target key end

     0   :  { %10 = vsyncpa [#allocation3], 0  ;;  %s1145_s0 = inlined_call_operand.vmem [shape: f32[256,64], index: 0, kind: input, shape index: {}]   ;;  %s1146_s1 = inlined_call_operand.vmem [shape: bf16[64,128], index: 1, kind: input, shape index: {}]   ;;  %s1147_s2 = inlined_call_operand.vmem [shape: bf16[128,8], index: 2, kind: input, shape index: {}]   ;;  %s1148_s3 = inlined_call_operand.hbm [shape: bf16[256,128], index: 3, kind: output, shape index: {0}]   ;;  %s1149_s4 = inlined_call_operand.vmem [shape: f32[256,8], index: 4, kind: output, shape index: {1}]  }
   0x1   :  { %12 = vsyncpa [#allocation3 + $0x1], 0  ;;  %s940_s15 = smov 0   ;;  %s942_s16 = smov 0  }
   0x2   :  { %s944_s17 = smov 0   ;;  %s946_s18 = smov 0  }
   0x3 LB: > { %s961_s19 = sadd.s32 4294967295, %s911_s18   ;;  %s666_s20 = sadd.s32 4294967294, %s911_s18   ;;  %s911_s18 = sphi %s946_s18, %s1155_s18   ;;  %s907_s17 = sphi %s944_s17, %s1154_s17   ;;  %s903_s16 = sphi %s942_s16, %s1153_s16   ;;  %s899_s15 = sphi %s940_s15, %s1152_s15  }
   0x4   : > { %s965_s21 = sadd.s32 1, %s911_s18   ;;  %s93_s22 = sadd.s32 1, %s907_s17 }
   0x5   : > { %s90_s23 = ssub.s32 %s911_s18, %s965_s21  ;;  %p103_p0 = scmp.ne.s32.totalorder %s907_s17, %s903_s16 }
   0x6   : > { %p91_p1 = scmp.eq.s32.totalorder %s90_s23, 0  ;;  %p104_p2 = scmp.eq.s32.totalorder %s961_s19, 1 }
   0x7   : > { %p109_p3 = scmp.ne.s32.totalorder %s903_s16, %s899_s15  ;;  %p110_p4 = scmp.eq.s32.totalorder %s666_s20, 1 }
   0x8   : > { %s976_s24 = scalar_select %p91_p1, %s907_s17, %s93_s22  }
   0x9   : > { %p978_p5 = por %p104_p2, %p103_p0  ;;  %p982_p6 = por %p110_p4, %p109_p3 }
   0xa   : > { %p669_p7 = scmp.ge.s32.totalorder %s911_s18, 1  ;;  %p169_p8 = scmp.lt.s32.totalorder %s911_s18, 3 }
   0xc   : > { %p170_p9 = pnand %p669_p7, %p169_p8 }
   0xd   : > { %s671_s29 = sshll.u32 (!%p170_p9), %s961_s19, 4  ;;  %s190_s20 = sand.u32 (!%p170_p9), 1, %s903_s16  }
   0xe   : > { %173 = sbr.rel (%p170_p9) target bundleno = 428 (0x1ac), region = 32  ;;  %p201_p10 = scmp.lt.s32.totalorder (!%p170_p9), %s671_s29, 31 }
   0xf   : > { %s670_s22 = sshll.u32 (!%p170_p9), %s190_s20, 6  ;;  %s748_s27 = sshll.u32 (!%p170_p9), %s961_s19, 6 }
  0x10   : > { %s1062_s23 = scalar_lea.vmem (!%p170_p9), [#allocation2], %s670_s22  ;;  %s571_s9 = scalar_lea.hbm (!%p170_p9), %s1148_s3, %s748_s27 }
  0x11   : > { %s572_s10 = sshll.u32 (!%p170_p9), %s1062_s23, 4  ;;  %s555_s12 = scalar_lea.sflag (!%p170_p9), [#allocation3], %s190_s20  ;;  %s573_s10 = int_to_ptr.vmem [resolvable:$true] %s572_s10 }
  0x12   : > { %s869_s14 = scalar_lea.hbm (!%p170_p9), %s1148_s3, 128 }
  0x13   : > { %v739_v0 = vld [vmem:[%s1146_s1 + $0x18] sm:$0xff]  ;;  %v738_v1 = vld [vmem:[%s1146_s1 + $0x10] sm:$0xff]  ;;  %s1157_s29 = smov (!%p201_p10, %s671_s29), 31  ;;  %v737_v2 = vld [vmem:[%s1146_s1 + $0x8] sm:$0xff]  ;;  %vm270_vm0 = vcmask 523264   ;;  %vm521_vm1 = vcmask 64512  }
  0x14   : > { %299 = vmatpush.bf16.msra.mxu0 %v739_v0  ;;  %796 = vmatpush.bf16.msra.mxu3 %v739_v0  ;;  %s672_s6 = sshll.u32 %s1157_s29, 3  ;;  %v736_v3 = vld [vmem:[%s1146_s1] sm:$0xff]  ;;  %v747_v16 = vld [vmem:[%s1147_s2 + $0x38] sm:$0xff]  ;;  %v746_v17 = vld [vmem:[%s1147_s2 + $0x30] sm:$0xff] }
  0x15   : > { %s1006_s11 = scalar_lea.vmem %s1145_s0, %s672_s6  ;;  %472 = vmatpush.bf16.msra.mxu1 %v747_v16  ;;  %800 = vmatpush.bf16.msra.mxu2 %v747_v16  ;;  %v745_v18 = vld [vmem:[%s1147_s2 + $0x28] sm:$0xff]  ;;  %v744_v24 = vld [vmem:[%s1147_s2 + $0x20] sm:$0xff]  ;;  %v743_v32 = vld [vmem:[%s1147_s2 + $0x18] sm:$0xff]  ;;  %s1078_s5 = scalar_lea.vmem %s1149_s4, %s672_s6 }
  0x16   : > { %v214_v4 = vld [vmem:[%s1006_s11] sm:$0xff]  ;;  %v215_v5 = vld [vmem:[%s1006_s11 + $0x8] sm:$0xff]  ;;  %v216_v7 = vld [vmem:[%s1006_s11 + $0x10] sm:$0xff] }
  0x17   : > { %v230_v6 = vpack.c.bf16 %v215_v5, %v214_v4  ;;  %v217_v8 = vld [vmem:[%s1006_s11 + $0x18] sm:$0xff]  ;;  %v218_v10 = vld [vmem:[%s1006_s11 + $0x20] sm:$0xff]  ;;  %v219_v11 = vld [vmem:[%s1006_s11 + $0x28] sm:$0xff] }
  0x18   : > { %300 = vmatpush.bf16.msra.mxu0 %v738_v1  ;;  %797 = vmatpush.bf16.msra.mxu3 %v738_v1  ;;  %v231_v9 = vpack.c.bf16 %v217_v8, %v216_v7  ;;  %v232_v12 = vpack.c.bf16 %v219_v11, %v218_v10  ;;  %v224_v13 = vld [vmem:[%s1006_s11 + $0x50] sm:$0xff]  ;;  %v225_v14 = vld [vmem:[%s1006_s11 + $0x58] sm:$0xff]  ;;  %v226_v21 = vld [vmem:[%s1006_s11 + $0x60] sm:$0xff] }
  0x19   : > { %v235_v15 = vpack.c.bf16 %v225_v14, %v224_v13  ;;  %473 = vmatpush.bf16.msra.mxu1 %v746_v17  ;;  %801 = vmatpush.bf16.msra.mxu2 %v746_v17  ;;  %v220_v19 = vld [vmem:[%s1006_s11 + $0x30] sm:$0xff]  ;;  %v221_v20 = vld [vmem:[%s1006_s11 + $0x38] sm:$0xff]  ;;  %v227_v22 = vld [vmem:[%s1006_s11 + $0x68] sm:$0xff] }
  0x1a   : > { %v233_v23 = vpack.c.bf16 %v221_v20, %v220_v19  ;;  %v236_v25 = vpack.c.bf16 %v227_v22, %v226_v21  ;;  %v222_v26 = vld [vmem:[%s1006_s11 + $0x40] sm:$0xff]  ;;  %v223_v27 = vld [vmem:[%s1006_s11 + $0x48] sm:$0xff]  ;;  %v228_v28 = vld [vmem:[%s1006_s11 + $0x70] sm:$0xff] }
  0x1b   : > { %v229_v29 = vld [vmem:[%s1006_s11 + $0x78] sm:$0xff]  ;;  %v234_v30 = vpack.c.bf16 %v223_v27, %v222_v26  ;;  %v742_v33 = vld [vmem:[%s1147_s2 + $0x10] sm:$0xff]  ;;  %v741_v34 = vld [vmem:[%s1147_s2 + $0x8] sm:$0xff]  ;;  %s574_s11 = sshll.u32 %s571_s9, 4  ;;  %s575_s11 = int_to_ptr.hbm [resolvable:$true] %s574_s11 }
  0x1c   : > { %301 = vmatpush.bf16.msra.mxu0 %v737_v2  ;;  %798 = vmatpush.bf16.msra.mxu3 %v737_v2  ;;  %v237_v31 = vpack.c.bf16 %v229_v29, %v228_v28  ;;  %v740_v35 = vld [vmem:[%s1147_s2] sm:$0xff]  ;;  %s863_s13 = sshra.s32 %s575_s11, 4  ;;  %s864_s13 = int_to_ptr.hbm [resolvable:$true] %s863_s13 }
  0x1d   : > { %474 = vmatpush.bf16.msra.mxu1 %v745_v18  ;;  %802 = vmatpush.bf16.msra.mxu2 %v745_v18  ;;  %s865_s19 = scalar_lea.hbm %s864_s13, 64  ;;  %p870_p0 = scmp.lt.s32.totalorder %s864_s13, %s1148_s3 }
  0x1e   : > { %p866_p11 = scmp.ne.s32.totalorder %s864_s13, %s865_s19  ;;  %p871_p1 = scmp.lt.s32.totalorder %s869_s14, %s865_s19 }
  0x20   : > { %302 = vmatpush.bf16.msra.mxu0 %v736_v3  ;;  %799 = vmatpush.bf16.msra.mxu3 %v736_v3  ;;  %p867_p12 = pnand %p866_p11, %p978_p5  ;;  %p872_p2 = por %p871_p1, %p870_p0 }
  0x21   : > { %475 = vmatpush.bf16.msra.mxu1 %v744_v24  ;;  %803 = vmatpush.bf16.msra.mxu2 %v744_v24 }
  0x22   : > { %p868_p13 = pneg %p867_p12 }
  0x23   : > { %691 = vmatmul.msk.bf16.vlgmr.msra.gmra.mxu0 %vm270_vm0, %v230_v6  ;;  %696 = vmatmul.msk.bf16.vlgmr.msra.gmra.mxu3 %vm270_vm0, %v235_v15 }
  0x24   : > { %p873_p3 = pnand %p872_p2, %p868_p13 }
  0x25   : > { %476 = vmatpush.bf16.msra.mxu1 %v743_v32  ;;  %804 = vmatpush.bf16.msra.mxu2 %v743_v32 }
  0x29   : > { %477 = vmatpush.bf16.msra.mxu1 %v742_v33  ;;  %805 = vmatpush.bf16.msra.mxu2 %v742_v33 }
  0x2d   : > { %478 = vmatpush.bf16.msra.mxu1 %v741_v34  ;;  %806 = vmatpush.bf16.msra.mxu2 %v741_v34 }
  0x31   : > { %479 = vmatpush.bf16.msra.mxu1 %v740_v35  ;;  %807 = vmatpush.bf16.msra.mxu2 %v740_v35 }
  0x33   : > { %692 = vmatmul.msk.bf16.gmra.mxu0 %vm270_vm0, %v231_v9  ;;  %697 = vmatmul.msk.bf16.gmra.mxu3 %vm270_vm0, %v236_v25 }
  0x43   : > { %693 = vmatmul.msk.bf16.gmra.mxu0 %vm270_vm0, %v232_v12  ;;  %698 = vmatmul.msk.bf16.gmra.mxu3 %vm270_vm0, %v237_v31 }
  0x53   : > { %694 = vmatmul.msk.bf16.gmra.mxu0 %vm270_vm0, %v233_v23 }
  0x63   : > { %695 = vmatmul.msk.bf16.gmra.mxu0 %vm270_vm0, %v234_v30 }
  0xa0   : > { %v304_v36 = vpop.f32.mrf.mxu0 }
  0xa1   : > { %v344_v37 = vpack.c.bf16 %v304_v36, %v304_v36 }
  0xa3   : > { %v392_v41 = vunpack.c.l.b16 %v344_v37 }
  0xa6   : > { %v329_v55 = vpop.f32.mrf.mxu3 }
  0xa7   : > { %v354_v21 = vpack.c.bf16 %v329_v55, %v329_v55 }
  0xa8   : > { %v306_v38 = vpop.f32.mrf.mxu0 }
  0xa9   : > { %v345_v39 = vpack.c.bf16 %v306_v38, %v306_v38  ;;  %v752_v40 = vpack.c.bf16 %v306_v38, %v304_v36  ;;  %v402_v23 = vunpack.c.l.b16 %v354_v21 }
  0xab   : > { %v393_v42 = vunpack.c.l.b16 %v345_v39  ;;  %753 = vst [vmem:[%s1062_s23] sm:$0xff] %v752_v40  }
  0xad   : > { %v408_v43 = vpack.c.b16 %v393_v42, %v392_v41 }
  0xae   : > { %v331_v62 = vpop.f32.mrf.mxu3 }
  0xaf   : > { %480 = vmatmul.bf16.vlgmr.msra.gmra.mxu1 %v408_v43  ;;  %v777_v63 = vpack.c.bf16 %v331_v62, %v329_v55  ;;  %v355_v22 = vpack.c.bf16 %v331_v62, %v331_v62 }
  0xb0   : > { %v309_v44 = vpop.f32.mrf.mxu0 }
  0xb1   : > { %v346_v45 = vpack.c.bf16 %v309_v44, %v309_v44  ;;  %793 = vst [vmem:[%s1062_s23 + $0x28] sm:$0xff] %v777_v63   ;;  %v403_v24 = vunpack.c.l.b16 %v355_v22 }
  0xb3   : > { %v394_v49 = vunpack.c.l.b16 %v346_v45  ;;  %v413_v25 = vpack.c.b16 %v403_v24, %v402_v23 }
  0xb6   : > { %v334_v2 = vpop.f32.mrf.mxu3 }
  0xb7   : > { %v356_v26 = vpack.c.bf16 %v334_v2, %v334_v2 }
  0xb8   : > { %v311_v46 = vpop.f32.mrf.mxu0 }
  0xb9   : > { %v347_v47 = vpack.c.bf16 %v311_v46, %v311_v46  ;;  %v757_v48 = vpack.c.bf16 %v311_v46, %v309_v44  ;;  %v404_v28 = vunpack.c.l.b16 %v356_v26 }
  0xbb   : > { %v395_v50 = vunpack.c.l.b16 %v347_v47  ;;  %789 = vst [vmem:[%s1062_s23 + $0x8] sm:$0xff] %v757_v48  }
  0xbd   : > { %v409_v51 = vpack.c.b16 %v395_v50, %v394_v49 }
  0xbe   : > { %v336_v9 = vpop.f32.mrf.mxu3 }
  0xbf   : > { %485 = vmatmul.bf16.gmra.mxu1 %v409_v51  ;;  %v782_v10 = vpack.c.bf16 %v336_v9, %v334_v2  ;;  %v357_v27 = vpack.c.bf16 %v336_v9, %v336_v9 }
  0xc0   : > { %v314_v52 = vpop.f32.mrf.mxu0 }
  0xc1   : > { %v348_v53 = vpack.c.bf16 %v314_v52, %v314_v52  ;;  %794 = vst [vmem:[%s1062_s23 + $0x30] sm:$0xff] %v782_v10   ;;  %v405_v29 = vunpack.c.l.b16 %v357_v27 }
  0xc3   : > { %v396_v58 = vunpack.c.l.b16 %v348_v53  ;;  %v414_v30 = vpack.c.b16 %v405_v29, %v404_v28 }
  0xc6   : > { %v339_v13 = vpop.f32.mrf.mxu3 }
  0xc7   : > { %v358_v31 = vpack.c.bf16 %v339_v13, %v339_v13 }
  0xc8   : > { %v316_v54 = vpop.f32.mrf.mxu0 }
  0xc9   : > { %v349_v56 = vpack.c.bf16 %v316_v54, %v316_v54  ;;  %v762_v57 = vpack.c.bf16 %v316_v54, %v314_v52  ;;  %v406_v33 = vunpack.c.l.b16 %v358_v31 }
  0xcb   : > { %v397_v59 = vunpack.c.l.b16 %v349_v56  ;;  %790 = vst [vmem:[%s1062_s23 + $0x10] sm:$0xff] %v762_v57  }
  0xcd   : > { %v410_v60 = vpack.c.b16 %v397_v59, %v396_v58 }
  0xce   : > { %v341_v19 = vpop.f32.mrf.mxu3 }
  0xcf   : > { %490 = vmatmul.bf16.gmra.mxu1 %v410_v60  ;;  %v787_v20 = vpack.c.bf16 %v341_v19, %v339_v13  ;;  %v359_v32 = vpack.c.bf16 %v341_v19, %v341_v19 }
  0xd0   : > { %v319_v61 = vpop.f32.mrf.mxu0 }
  0xd1   : > { %v350_v0 = vpack.c.bf16 %v319_v61, %v319_v61  ;;  %795 = vst [vmem:[%s1062_s23 + $0x38] sm:$0xff] %v787_v20   ;;  %v407_v34 = vunpack.c.l.b16 %v359_v32 }
  0xd3   : > { %v398_v5 = vunpack.c.l.b16 %v350_v0  ;;  %v415_v35 = vpack.c.b16 %v407_v34, %v406_v33 }
  0xd8   : > { %v321_v1 = vpop.f32.mrf.mxu0 }
  0xd9   : > { %v351_v3 = vpack.c.bf16 %v321_v1, %v321_v1  ;;  %v767_v4 = vpack.c.bf16 %v321_v1, %v319_v61 }
  0xdb   : > { %v399_v6 = vunpack.c.l.b16 %v351_v3  ;;  %791 = vst [vmem:[%s1062_s23 + $0x18] sm:$0xff] %v767_v4  }
  0xdd   : > { %v411_v7 = vpack.c.b16 %v399_v6, %v398_v5 }
  0xdf   : > { %495 = vmatmul.bf16.gmra.mxu1 %v411_v7 }
  0xe0   : > { %v324_v8 = vpop.f32.mrf.mxu0 }
  0xe1   : > { %v352_v11 = vpack.c.bf16 %v324_v8, %v324_v8 }
  0xe3   : > { %v400_v16 = vunpack.c.l.b16 %v352_v11 }
  0xe8   : > { %v326_v12 = vpop.f32.mrf.mxu0 }
  0xe9   : > { %v353_v14 = vpack.c.bf16 %v326_v12, %v326_v12  ;;  %v772_v15 = vpack.c.bf16 %v326_v12, %v324_v8 }
  0xeb   : > { %v401_v17 = vunpack.c.l.b16 %v353_v14  ;;  %792 = vst [vmem:[%s1062_s23 + $0x20] sm:$0xff] %v772_v15  }
  0xed   : > { %v412_v18 = vpack.c.b16 %v401_v17, %v400_v16 }
  0xef   : > { %500 = vmatmul.bf16.vlgmr.msra.gmra.mxu2 %v412_v18 }
  0xff   : > { %505 = vmatmul.bf16.gmra.mxu2 %v413_v25 }
 0x10f   : > { %510 = vmatmul.bf16.gmra.mxu2 %v414_v30 }
 0x11f   : > { %515 = vmatmul.bf16.gmra.mxu2 %v415_v35 }
 0x12c   : > { %v481_v36 = vpop.f32.mrf.mxu1 }
 0x12d   : > { %876 = shalt.err (!%p873_p3)
}
 0x12e   : > { %s913_s20 = smov 64   ;;  %s914_s27 = smov 4   ;;  %522 = vst.msk [vmem:[%s1078_s5] sm:$0xff] %vm521_vm1, %v481_v36 }
 0x12f   : > { %808 = dma.vmem_to_hbm [thread:$0]  (%p978_p5), %s573_s10, 1024, %s575_s11, %s555_s12, %s913_s20, %s913_s20, %s914_s27  }
 0x134   : > { %v483_v37 = vpop.f32.mrf.mxu1 }
 0x135   : > { %523 = vst.msk [vmem:[%s1078_s5 + $0x8] sm:$0xff] %vm521_vm1, %v483_v37 }
 0x13c   : > { %v486_v38 = vpop.f32.mrf.mxu1 }
 0x13d   : > { %524 = vst.msk [vmem:[%s1078_s5 + $0x10] sm:$0xff] %vm521_vm1, %v486_v38 }
 0x144   : > { %v488_v39 = vpop.f32.mrf.mxu1 }
 0x145   : > { %525 = vst.msk [vmem:[%s1078_s5 + $0x18] sm:$0xff] %vm521_vm1, %v488_v39 }
 0x14c   : > { %v491_v40 = vpop.f32.mrf.mxu1 }
 0x14d   : > { %526 = vst.msk [vmem:[%s1078_s5 + $0x20] sm:$0xff] %vm521_vm1, %v491_v40 }
 0x154   : > { %v493_v41 = vpop.f32.mrf.mxu1 }
 0x155   : > { %527 = vst.msk [vmem:[%s1078_s5 + $0x28] sm:$0xff] %vm521_vm1, %v493_v41 }
 0x15c   : > { %v496_v42 = vpop.f32.mrf.mxu1 }
 0x15d   : > { %528 = vst.msk [vmem:[%s1078_s5 + $0x30] sm:$0xff] %vm521_vm1, %v496_v42 }
 0x164   : > { %v498_v43 = vpop.f32.mrf.mxu1 }
 0x165   : > { %529 = vst.msk [vmem:[%s1078_s5 + $0x38] sm:$0xff] %vm521_vm1, %v498_v43 }
 0x172   : > { %v501_v44 = vpop.f32.mrf.mxu2 }
 0x173   : > { %530 = vst.msk [vmem:[%s1078_s5 + $0x40] sm:$0xff] %vm521_vm1, %v501_v44 }
 0x17a   : > { %v503_v45 = vpop.f32.mrf.mxu2 }
 0x17b   : > { %531 = vst.msk [vmem:[%s1078_s5 + $0x48] sm:$0xff] %vm521_vm1, %v503_v45 }
 0x182   : > { %v506_v46 = vpop.f32.mrf.mxu2 }
 0x183   : > { %532 = vst.msk [vmem:[%s1078_s5 + $0x50] sm:$0xff] %vm521_vm1, %v506_v46 }
 0x18a   : > { %v508_v47 = vpop.f32.mrf.mxu2 }
 0x18b   : > { %533 = vst.msk [vmem:[%s1078_s5 + $0x58] sm:$0xff] %vm521_vm1, %v508_v47 }
 0x192   : > { %v511_v48 = vpop.f32.mrf.mxu2 }
 0x193   : > { %534 = vst.msk [vmem:[%s1078_s5 + $0x60] sm:$0xff] %vm521_vm1, %v511_v48 }
 0x19a   : > { %v513_v49 = vpop.f32.mrf.mxu2 }
 0x19b   : > { %535 = vst.msk [vmem:[%s1078_s5 + $0x68] sm:$0xff] %vm521_vm1, %v513_v49 }
 0x1a2   : > { %v516_v50 = vpop.f32.mrf.mxu2 }
 0x1a3   : > { %536 = vst.msk [vmem:[%s1078_s5 + $0x70] sm:$0xff] %vm521_vm1, %v516_v50 }
 0x1aa   : > { %v518_v51 = vpop.f32.mrf.mxu2 }
 0x1ab   : > { %537 = vst.msk [vmem:[%s1078_s5 + $0x78] sm:$0xff] %vm521_vm1, %v518_v51 }
 0x1ac PF: > { %p814_p4 = scmp.ge.s32.totalorder %s911_s18, 2  ;;  %s593_s25 = sand.u32 1, %s899_s15  }
 0x1ad   : > { %s594_s28 = scalar_lea.sflag [#allocation3], %s593_s25 }
 0x1ae   : > { %p811_p5 = pnand %p814_p4, %p982_p6 }
 0x1b0   : > { %p812_p7 = pneg %p811_p5 }
 0x1b2   : > { %894 = dma.done.wait (%p812_p7), %s594_s28, 1024  }
 0x1b3   : > { %896 = vsyncadd (%p812_p7), %s594_s28, 4294966272  ;;  %p15_p8 = scmp.ge.s32.totalorder %s965_s21, 4   ;;  %s1152_s15 = smov %s903_s16 }
 0x1b4   : > { %s1153_s16 = smov %s907_s17  ;;  %s1154_s17 = smov %s976_s24 }
 0x1b5   : > { %s1155_s18 = smov %s965_s21  ;;  %17 = sbr.rel (!%p15_p8) target bundleno = 3 (0x3), region = 79 }
 0x1ba   :  { %608 = vsyncpa [#allocation3], 1 }
 0x1bb   :  { %610 = vsyncpa [#allocation3 + $0x1], 1 }

</bundles_post_ra>
